<compile_context>
chip_gen: v7x
topology: tpu7x:2x2x1
jax: 0.10.0
libtpu: 0.0.40
codegen_flags: <defaults>
</compile_context>

<pallas_src>
import jax
import jax.numpy as jnp
from jax.experimental import pallas as pl
from jax.experimental.pallas import tpu as pltpu


# ---------------------------------------------------------------------------
# Per-generation VMEM sizing helpers
# ---------------------------------------------------------------------------
def _vmem_capacity_bytes():
    try:
        return int(pltpu.get_tpu_info().vmem_capacity_bytes)
    except Exception:
        return 64 * 1024 * 1024          # conservative (v7x per-core VMEM)


def _vmem_limit_bytes():
    # leave ~25% headroom below physical VMEM (128 MiB on v5e/v6e, 64 MiB on v7x)
    return (_vmem_capacity_bytes() * 3) // 4


def _pick_v_tile(V, M, B, wp_itemsize, budget_bytes=None):
    """Largest lane-dense (multiple-of-128) Wp tile fitting a per-generation VMEM budget."""
    if budget_bytes is None:
        budget_bytes = _vmem_capacity_bytes() // 3
    # bytes per lane column while streaming: 2x Wp buffers + 2x [scale;bias] f32 + 2x logits f32
    per_col = 2 * max(M, 8) * wp_itemsize + 2 * 2 * 4 + 2 * max(B, 8) * 4
    tv = (budget_bytes // per_col) // 128 * 128
    tv = int(min(max(tv, 128), 8192))
    return V if V <= tv else tv


# ---------------------------------------------------------------------------
# Kernel 1: encoder-side precompute (hoisted out of the recurrent decode step)
# ---------------------------------------------------------------------------
def _encoder_projection_kernel(outputs_ref, wo_ref, bo_ref, oproj_ref):
    B, Ts, H2 = outputs_ref.shape
    A = wo_ref.shape[1]
    proj = jnp.dot(outputs_ref[...].reshape(B * Ts, H2).astype(wo_ref.dtype), wo_ref[...],
                   preferred_element_type=jnp.float32)
    proj = proj + bo_ref[...]                                      # bias stays f32
    oproj_ref[...] = proj.reshape(B, Ts, A).astype(oproj_ref.dtype)


def precompute_encoder_projection(packed, outputs, *, s_tile=256):
    """outputs @ Wo^T + bo, computed ONCE per sequence, tiled over S, stored in compute dtype."""
    B, S, H2 = outputs.shape
    A = packed["wo_t"].shape[1]
    cdt = packed["compute_dtype"]
    ts = S if S <= s_tile else s_tile
    if ts != S and ts % 8 != 0:            # keep the collapsed (B*Ts) reshape sublane-aligned
        ts = max(8, ts - ts % 8)
    ns = pl.cdiv(S, ts)

    grid_spec = pltpu.PrefetchScalarGridSpec(
        num_scalar_prefetch=0,
        grid=(ns,),
        in_specs=[
            pl.BlockSpec((B, ts, H2), lambda s: (0, s, 0)),        # outputs S-tile
            pl.BlockSpec((H2, A), lambda s: (0, 0)),               # Wo resident
            pl.BlockSpec((1, A), lambda s: (0, 0)),                # bo resident (f32)
        ],
        out_specs=pl.BlockSpec((B, ts, A), lambda s: (0, s, 0)),
    )
    return pl.pallas_call(
        _encoder_projection_kernel,
        out_shape=jax.ShapeDtypeStruct((B, S, A), cdt),
        grid_spec=grid_spec,
        compiler_params=pltpu.CompilerParams(
            dimension_semantics=("parallel",),
            vmem_limit_bytes=_vmem_limit_bytes(),
        ),
    )(outputs.astype(cdt), packed["wo_t"], packed["bo"])


# ---------------------------------------------------------------------------
# Kernel 2: recurrent cell (attention + GRU + maxout), one invocation per step
# ---------------------------------------------------------------------------
def _decoder_cell_kernel(emb_ref,      # [B, E]        gathered embedding rows (f32)
                         hidden_ref,   # [B, H]        previous hidden state (f32)
                         outputs_ref,  # [B, S, 2H]    encoder outputs (compute dtype)
                         oproj_ref,    # [B, S, A]     hoisted encoder projection (+bo)
                         wh_ref,       # [H+1, A]      hidden projection with bh folded in
                         v_ref,        # [1, A]        energy scale vector (f32)
                         wa_ref,       # [E+2H+1, 3H+2M] row-group A: gi + maxout(emb,wv)
                         wb_ref,       # [H+1,    3H+2M] row-group B: gh + maxout(hidden)
                         newh_ref,     # out [B, H]    new hidden state (f32)
                         mo_ref):      # out [B, M]    maxout activations (compute dtype)
    hidden = hidden_ref[...]
    B, H = hidden.shape
    M = mo_ref.shape[1]
    cdt = wa_ref.dtype
    ones = jnp.ones((B, 1), jnp.float32)

    # -- Bahdanau attention (encoder projection already precomputed) --
    hproj = jnp.dot(jnp.concatenate([hidden, ones], axis=1).astype(cdt), wh_ref[...],
                    preferred_element_type=jnp.float32)                       # [B, A]
    e = jnp.tanh(hproj[:, None, :] + oproj_ref[...].astype(jnp.float32))      # [B, S, A]
    energy = jnp.sum(e * v_ref[...][None, :, :], axis=-1)                     # [B, S]
    energy = energy - jnp.max(energy, axis=1, keepdims=True)
    expw = jnp.exp(energy)
    attn = expw * pl.reciprocal(jnp.sum(expw, axis=1, keepdims=True), approx=True)
    wv = jnp.sum(attn[:, :, None] * outputs_ref[...].astype(jnp.float32), axis=1)  # [B, 2H]

    # -- GRU + maxout: two DENSE row-group matmuls (no structural zero blocks) --
    xa = jnp.concatenate([emb_ref[...], wv, ones], axis=1).astype(cdt)        # [B, E+2H+1]
    xb = jnp.concatenate([hidden, ones], axis=1).astype(cdt)                  # [B, H+1]
    fa = jnp.dot(xa, wa_ref[...], preferred_element_type=jnp.float32)         # [B, 3H+2M]
    fb = jnp.dot(xb, wb_ref[...], preferred_element_type=jnp.float32)         # [B, 3H+2M]

    gi, moa = fa[:, :3 * H], fa[:, 3 * H:]
    gh, mob = fb[:, :3 * H], fb[:, 3 * H:]

    r = jax.nn.sigmoid(gi[:, :H] + gh[:, :H])
    z = jax.nn.sigmoid(gi[:, H:2 * H] + gh[:, H:2 * H])
    n = jnp.tanh(gi[:, 2 * H:] + r * gh[:, 2 * H:])
    newh_ref[...] = (1.0 - z) * n + z * hidden

    # maxout: weight columns were pre-permuted so pairs (2j,2j+1) -> (j, M+j)
    mo_in = moa + mob                                                          # [B, 2M]
    mo_ref[...] = jnp.maximum(mo_in[:, :M], mo_in[:, M:]).astype(mo_ref.dtype)


def _decoder_cell(packed, emb_x, hidden, outputs, oproj):
    B, H = hidden.shape
    cdt = packed["compute_dtype"]
    M = packed["wp"].shape[0]
    vmem = pl.BlockSpec(memory_space=pltpu.MemorySpace.VMEM)
    newh, mo = pl.pallas_call(
        _decoder_cell_kernel,
        out_shape=(jax.ShapeDtypeStruct((B, H), jnp.float32),
                   jax.ShapeDtypeStruct((B, M), cdt)),
        in_specs=[vmem] * 8,
        out_specs=(vmem, vmem),
        compiler_params=pltpu.CompilerParams(vmem_limit_bytes=_vmem_limit_bytes()),
    )(emb_x.astype(jnp.float32), hidden.astype(jnp.float32),
      outputs.astype(cdt), oproj.astype(cdt),
      packed["wh_aug"], packed["v"], packed["wa"], packed["wb"])
    return newh, mo


# ---------------------------------------------------------------------------
# Kernel 3: vocab projection, Wp streamed over a lane-dense V grid ("parallel")
# ---------------------------------------------------------------------------
def _vocab_projection_kernel(mo_ref, wp_ref, affine_ref, pred_ref):
    # wp tile may be int8 (weight-only quant) / bf16 / f32; upcast then one MXU push.
    acc = jnp.dot(mo_ref[...].astype(jnp.float32), wp_ref[...].astype(jnp.float32),
                  preferred_element_type=jnp.float32)              # [B, tv]
    pred_ref[...] = acc * affine_ref[0:1, :] + affine_ref[1:2, :]  # dequant scale + bp


def _vocab_projection(packed, mo, *, v_tile=None):
    B, M = mo.shape
    V = packed["wp"].shape[1]
    wp_itemsize = jnp.dtype(packed["wp"].dtype).itemsize
    tv = _pick_v_tile(V, M, B, wp_itemsize) if v_tile is None else v_tile
    nv = pl.cdiv(V, tv)

    grid_spec = pltpu.PrefetchScalarGridSpec(
        num_scalar_prefetch=0,
        grid=(nv,),
        in_specs=[
            pl.BlockSpec((B, M), lambda j: (0, 0)),                # mo stays resident
            pl.BlockSpec((M, tv), lambda j: (0, j)),               # Wp tile streams
            pl.BlockSpec((2, tv), lambda j: (0, j)),               # [scale; bias] rows
        ],
        out_specs=pl.BlockSpec((B, tv), lambda j: (0, j)),         # logits tile
    )
    return pl.pallas_call(
        _vocab_projection_kernel,
        out_shape=jax.ShapeDtypeStruct((B, V), jnp.float32),
        grid_spec=grid_spec,
        compiler_params=pltpu.CompilerParams(
            dimension_semantics=("parallel",),   # independent V tiles -> v7x megacore splits them
            vmem_limit_bytes=_vmem_limit_bytes(),
        ),
    )(mo, packed["wp"], packed["wp_affine"])


# ---------------------------------------------------------------------------
# Host-side parameter packing and step wrapper
# ---------------------------------------------------------------------------
def pack_decoder_params(p, compute_dtype=jnp.float32, wp_dtype=None):
    """Pack PyTorch-layout parameters into the fused kernel weights (done once)."""
    H = p["Whh"].shape[1]
    E = p["emb"].shape[1]
    two_m = p["Wlh"].shape[0]
    V = p["Wp"].shape[0]
    # maxout pairs (2j, 2j+1) -> columns (j, M+j): the max becomes a half/half compare
    perm = jnp.concatenate([jnp.arange(0, two_m, 2), jnp.arange(1, two_m, 2)])

    nc = 3 * H + two_m                       # cols: [gi or gh | maxout partial]

    # Row group A: [emb | wv | 1]  -> gi and the emb/wv maxout partial (dense, no zeros)
    ka = E + 2 * H + 1
    wa = jnp.zeros((ka, nc), jnp.float32)
    wa = wa.at[:E + 2 * H, :3 * H].set(p["Wih"].T)                 # gi <- [emb | wv]
    wa = wa.at[ka - 1, :3 * H].set(p["bih"])
    wa = wa.at[:E, 3 * H:].set(p["Wle"].T[:, perm])                # maxout <- emb
    wa = wa.at[E:E + 2 * H, 3 * H:].set(p["Wwv"].T[:, perm])       # maxout <- wv
    wa = wa.at[ka - 1, 3 * H:].set((p["ble"] + p["bwv"])[perm])

    # Row group B: [hidden | 1]  -> gh and the hidden maxout partial (dense, no zeros)
    kb = H + 1
    wb = jnp.zeros((kb, nc), jnp.float32)
    wb = wb.at[:H, :3 * H].set(p["Whh"].T)
    wb = wb.at[kb - 1, :3 * H].set(p["bhh"])
    wb = wb.at[:H, 3 * H:].set(p["Wlh"].T[:, perm])
    wb = wb.at[kb - 1, 3 * H:].set(p["blh"][perm])

    # Output projection: M rows (bp applied post-dot); optional weight-only int8 storage.
    wp_t = p["Wp"].T                         # [M, V]
    bp = p["bp"].astype(jnp.float32)
    if wp_dtype == jnp.int8:
        scale = jnp.maximum(jnp.max(jnp.abs(wp_t), axis=0, keepdims=True), 1e-8) / 127.0
        wp = jnp.clip(jnp.round(wp_t / scale), -127, 127).astype(jnp.int8)
        affine = jnp.concatenate([scale.astype(jnp.float32), bp[None, :]], axis=0)
    else:
        wdt = compute_dtype if wp_dtype is None else wp_dtype
        wp = wp_t.astype(wdt)
        affine = jnp.concatenate([jnp.ones((1, V), jnp.float32), bp[None, :]], axis=0)

    return {
        "compute_dtype": compute_dtype,
        "emb": p["emb"].astype(jnp.float32),                       # gathered host-side
        "wh_aug": jnp.concatenate([p["Wh"].T, p["bh"][None, :]], 0).astype(compute_dtype),
        "v": p["v"].astype(jnp.float32),
        "wa": wa.astype(compute_dtype),
        "wb": wb.astype(compute_dtype),
        "wp": wp,                                                  # [M, V]
        "wp_affine": affine,                                       # [2, V]: scale / bias
        "wo_t": p["Wo"].T.astype(compute_dtype),                   # [2H, A]
        "bo": p["bo"].reshape(1, -1).astype(jnp.float32),          # [1, A]
    }


def rnn_attention_decoder_step(packed, x_ids, hidden, outputs, oproj=None, *, v_tile=None):
    """One autoregressive decode step. Returns (logits [B,V], new_hidden [B,H])."""
    if oproj is None:
        oproj = precompute_encoder_projection(packed, outputs)
    ids = x_ids.reshape(-1).astype(jnp.int32)
    emb_x = jnp.take(packed["emb"], ids, axis=0)       # host-side gather [B, E] (E is small)
    newh, mo = _decoder_cell(packed, emb_x, hidden, outputs, oproj)
    pred = _vocab_projection(packed, mo, v_tile=v_tile)
    return pred, newh


def rnn_attention_decoder(params, x_ids, hidden, outputs, compute_dtype=jnp.float32):
    """Exact single-step equivalent of RNNAttentionDecoder.forward."""
    packed = pack_decoder_params(params, compute_dtype)
    return rnn_attention_decoder_step(packed, x_ids, hidden, outputs)


# ---------------------------------------------------------------------------
# Pure-JAX reference (mirrors the PyTorch forward exactly)
# ---------------------------------------------------------------------------
def reference(params, x_ids, hidden, outputs):
    p = params
    B, S, _ = outputs.shape
    H = hidden.shape[1]
    hproj = hidden @ p["Wh"].T + p["bh"]
    oproj = outputs @ p["Wo"].T + p["bo"]
    energy = (jnp.tanh(hproj[:, None, :] + oproj) @ p["v"].T)[..., 0]
    attn = jax.nn.softmax(energy, axis=1)
    wv = jnp.einsum("bs,bsh->bh", attn, outputs)
    emb = p["emb"][x_ids[:, 0]]
    gru_in = jnp.concatenate([emb, wv], axis=1)
    gi = gru_in @ p["Wih"].T + p["bih"]
    gh = hidden @ p["Whh"].T + p["bhh"]
    r = jax.nn.sigmoid(gi[:, :H] + gh[:, :H])
    z = jax.nn.sigmoid(gi[:, H:2 * H] + gh[:, H:2 * H])
    n = jnp.tanh(gi[:, 2 * H:] + r * gh[:, 2 * H:])
    new_h = (1 - z) * n + z * hidden
    mo_in = (hidden @ p["Wlh"].T + p["blh"]
             + emb @ p["Wle"].T + p["ble"]
             + wv @ p["Wwv"].T + p["bwv"])
    mo = mo_in.reshape(B, mo_in.shape[1] // 2, 2).max(axis=2)
    pred = mo @ p["Wp"].T + p["bp"]
    return pred, new_h


def make_params(key, vocab, emb_dim, hidden, attn_dim, maxout):
    H, A, M, E, V = hidden, attn_dim, maxout, emb_dim, vocab
    shapes = {
        "emb": (V, E),
        "Wh": (A, H), "bh": (A,),
        "Wo": (A, 2 * H), "bo": (A,),
        "v": (1, A),
        "Wih": (3 * H, 2 * H + E), "bih": (3 * H,),
        "Whh": (3 * H, H), "bhh": (3 * H,),
        "Wwv": (2 * M, 2 * H), "bwv": (2 * M,),
        "Wlh": (2 * M, H), "blh": (2 * M,),
        "Wle": (2 * M, E), "ble": (2 * M,),
        "Wp": (V, M), "bp": (V,),
    }
    params = {}
    for name, shape in shapes.items():
        key, sub = jax.random.split(key)
        params[name] = (0.1 * jax.random.normal(sub, shape)).astype(jnp.float32)
    return params


if __name__ == "__main__":
    # B=8 fills the 8-sublane vreg height; V=256 keeps the logits/Wp tiles lane-dense.
    B, S, H, E, A, M, V = 8, 16, 32, 16, 32, 16, 256

    key = jax.random.PRNGKey(0)
    kp, kx, kh, ko = jax.random.split(key, 4)
    params = make_params(kp, vocab=V, emb_dim=E, hidden=H, attn_dim=A, maxout=M)

    x_ids = jax.random.randint(kx, (B, 1), 0, V, dtype=jnp.int32)      # last predicted ids
    hidden = jax.random.normal(kh, (B, H), dtype=jnp.float32)          # decoder hidden state
    outputs = jax.random.normal(ko, (B, S, 2 * H), dtype=jnp.float32)  # encoder outputs

    pred_ref, newh_ref = reference(params, x_ids, hidden, outputs)

    # ---- f32 path (exactness check; only the approx EUP reciprocal differs) ----
    packed = pack_decoder_params(params, compute_dtype=jnp.float32)
    oproj = precompute_encoder_projection(packed, outputs)             # hoisted, reused below
    pred, new_h = jax.block_until_ready(
        rnn_attention_decoder_step(packed, x_ids, hidden, outputs, oproj=oproj))
    assert pred.shape == (B, V) and new_h.shape == (B, H)
    assert jnp.allclose(pred, pred_ref, atol=5e-3, rtol=5e-3)
    assert jnp.allclose(new_h, newh_ref, atol=5e-3, rtol=5e-3)

    # ---- exercise the multi-tile Wp streaming grid explicitly (v_tile=128 -> 2 tiles) ----
    pred_tiled, newh_tiled = jax.block_until_ready(
        rnn_attention_decoder_step(packed, x_ids, hidden, outputs, oproj=oproj, v_tile=128))
    assert jnp.allclose(pred_tiled, pred, atol=1e-5, rtol=1e-5)
    assert jnp.allclose(newh_tiled, new_h, atol=1e-5, rtol=1e-5)

    # ---- bf16 storage for all large operands + weight-only int8 Wp (v5e/v6e/v7x safe) ----
    packed_q = pack_decoder_params(params, compute_dtype=jnp.bfloat16, wp_dtype=jnp.int8)
    oproj_q = precompute_encoder_projection(packed_q, outputs)
    pred_q, newh_q = jax.block_until_ready(
        rnn_attention_decoder_step(packed_q, x_ids, hidden, outputs, oproj=oproj_q))
    assert jnp.allclose(pred_q, pred_ref, atol=1e-1, rtol=1e-1)
    assert jnp.allclose(newh_q, newh_ref, atol=1e-1, rtol=1e-1)

    # ---- short greedy autoregressive roll-out reusing the hoisted encoder projection ----
    ids, h = x_ids, hidden
    for _ in range(3):
        logits, h = rnn_attention_decoder_step(packed, ids, h, outputs, oproj=oproj)
        ids = jnp.argmax(logits, axis=1).astype(jnp.int32).reshape(B, 1)
    jax.block_until_ready((logits, h))

    print("KERNEL_OK")
</pallas_src>

<mosaic_0001>
module attributes {stable_mosaic.version = 11 : i64} {
  func.func @_encoder_projection_kernel(%arg0: i32, %arg1: memref<8x16x64xf32, #tpu.memory_space<vmem>>, %arg2: memref<64x32xf32, #tpu.memory_space<vmem>>, %arg3: memref<1x32xf32, #tpu.memory_space<vmem>>, %arg4: memref<8x16x32xf32, #tpu.memory_space<vmem>>) attributes {dimension_semantics = [#tpu.dimension_semantics<parallel>], iteration_bounds = array<i64: 1>, scalar_prefetch = 0 : i64, scratch_operands = 0 : i64, tpu.core_type = #tpu.core_type<tc>, window_params = [{transform_indices = @transform_0, window_bounds = array<i64: 8, 16, 64>}, {pipeline_mode = #tpu.pipeline_mode<synchronous>, transform_indices = @transform_1, window_bounds = array<i64: 64, 32>}, {pipeline_mode = #tpu.pipeline_mode<synchronous>, transform_indices = @transform_2, window_bounds = array<i64: 1, 32>}, {transform_indices = @transform_3, window_bounds = array<i64: 8, 16, 32>}]} {
    %c0 = arith.constant 0 : index
    %c0_0 = arith.constant 0 : index
    %c0_1 = arith.constant 0 : index
    %0 = vector.load %arg1[%c0, %c0_0, %c0_1] : memref<8x16x64xf32, #tpu.memory_space<vmem>>, vector<8x16x64xf32>
    %1 = vector.shape_cast %0 : vector<8x16x64xf32> to vector<128x64xf32>
    %c0_2 = arith.constant 0 : index
    %c0_3 = arith.constant 0 : index
    %2 = vector.load %arg2[%c0_2, %c0_3] : memref<64x32xf32, #tpu.memory_space<vmem>>, vector<64x32xf32>
    %cst = arith.constant dense<0.000000e+00> : vector<128x32xf32>
    %3 = tpu.matmul %1, %2, %cst {dimension_numbers = #tpu.dot_dimension_numbers<[1], [0], [0], [1], [0, 0, 1, 1], [], []>} : vector<128x64xf32>, vector<64x32xf32>, vector<128x32xf32> -> vector<128x32xf32>
    %c0_4 = arith.constant 0 : index
    %c0_5 = arith.constant 0 : index
    %4 = vector.load %arg3[%c0_4, %c0_5] : memref<1x32xf32, #tpu.memory_space<vmem>>, vector<1x32xf32>
    %5 = vector.broadcast %4 : vector<1x32xf32> to vector<128x32xf32>
    %6 = arith.addf %3, %5 : vector<128x32xf32>
    %7 = vector.shape_cast %6 : vector<128x32xf32> to vector<8x16x32xf32>
    %c0_6 = arith.constant 0 : index
    %c0_7 = arith.constant 0 : index
    %c0_8 = arith.constant 0 : index
    %8 = vector.load %arg4[%c0_6, %c0_7, %c0_8] : memref<8x16x32xf32, #tpu.memory_space<vmem>>, vector<8x16x32xf32>
    tpu.vector_store %arg4[%c0_6, %c0_7, %c0_8], %7 {strides = array<i32>} : memref<8x16x32xf32, #tpu.memory_space<vmem>>, vector<8x16x32xf32>,
    return
  }
  func.func @transform_0(%arg0: i32) -> (i32, i32, i32) {
    %c0_i32 = arith.constant 0 : i32
    %c0_i32_0 = arith.constant 0 : i32
    %c0_i32_1 = arith.constant 0 : i32
    return %c0_i32, %arg0, %c0_i32_0 : i32, i32, i32
  }
  func.func @transform_1(%arg0: i32) -> (i32, i32) {
    %c0_i32 = arith.constant 0 : i32
    %c0_i32_0 = arith.constant 0 : i32
    %c0_i32_1 = arith.constant 0 : i32
    return %c0_i32, %c0_i32_0 : i32, i32
  }
  func.func @transform_2(%arg0: i32) -> (i32, i32) {
    %c0_i32 = arith.constant 0 : i32
    %c0_i32_0 = arith.constant 0 : i32
    %c0_i32_1 = arith.constant 0 : i32
    return %c0_i32, %c0_i32_0 : i32, i32
  }
  func.func @transform_3(%arg0: i32) -> (i32, i32, i32) {
    %c0_i32 = arith.constant 0 : i32
    %c0_i32_0 = arith.constant 0 : i32
    %c0_i32_1 = arith.constant 0 : i32
    return %c0_i32, %arg0, %c0_i32_0 : i32, i32, i32
  }
}

</mosaic_0001>

<bundles_post_ra>
// kernel: tpu_custom_call.1
= control target key start
LH: loop header
LB: loop body
LE: loop exit
PB: predicated region body
PF: predicated region fallthrough
CT: control target
= control target key end

     0   :  { %8 = vsyncpa [#allocation3], 0  ;;  %s558_s0 = inlined_call_operand.hbm [shape: f32[8,16,64], index: 0, kind: input, shape index: {}]   ;;  %s559_s1 = inlined_call_operand.vmem [shape: f32[64,32], index: 1, kind: input, shape index: {}]   ;;  %s560_s2 = inlined_call_operand.vmem [shape: f32[1,32], index: 2, kind: input, shape index: {}]   ;;  %s561_s3 = inlined_call_operand.hbm [shape: f32[8,16,32], index: 3, kind: output, shape index: {}]  }
   0x1   :  { %9 = vsyncpa [#allocation4], 0  ;;  %s445_s12 = smov [#allocation2]   ;;  %s397_s16 = scalar_lea.hbm %s558_s0, 2048 }
   0x2   :  { %s15_s13 = sshll.u32 %s445_s12, 4  ;;  %p398_p0 = scmp.ne.s32.totalorder %s558_s0, %s397_s16  ;;  %s16_s13 = int_to_ptr.vmem [resolvable:$true] %s15_s13 }
   0x3   :  { %p401_p1 = scmp.lt.u32.totalorder %s397_s16, %s558_s0 }
   0x5   :  { %p403_p2 = pnand %p401_p1, %p398_p0 }
   0x7   :  { %406 = shalt.err (!%p403_p2)
}
   0x8   :  { %s407_s21 = scalar_lea.vmem %s16_s13, 2048  ;;  %p412_p4 = scmp.lt.s32.totalorder %s16_s13, %s16_s13 }
   0x9   :  { %p408_p3 = scmp.ne.s32.totalorder %s16_s13, %s407_s21  ;;  %p413_p5 = scmp.lt.s32.totalorder %s407_s21, %s407_s21 }
   0xb   :  { %p414_p6 = por %p413_p5, %p412_p4 }
   0xd   :  { %p415_p7 = pnand %p414_p6, %p408_p3 }
   0xf   :  { %418 = shalt.err (!%p415_p7)
}
  0x10   :  { %s446_s22 = smov 128   ;;  %s447_s23 = smov 8  }
  0x11   :  { %21 = dma.hbm_to_vmem [thread:$0]  %s558_s0, 2048, %s16_s13, [#allocation3], %s446_s22, %s446_s22, %s447_s23  }
  0x12   :  { %441 = dma.done.wait [#allocation3], 2048  }
  0x13   :  { %442 = vsyncadd [#allocation3], 4294965248  ;;  %v45_v0 = vld [vmem:[%s559_s1] sm:$0xff]  ;;  %v46_v1 = vld [vmem:[%s559_s1 + $0x8] sm:$0xff]  ;;  %vm60_vm0 = vcmask 523264   ;;  %vm254_vm1 = vcmask 261120  }
  0x14   :  { %v47_v2 = vld [vmem:[%s559_s1 + $0x10] sm:$0xff]  ;;  %v369_v3 = vpack.c.bf16 %v46_v1, %v45_v0  ;;  %v48_v4 = vld [vmem:[%s559_s1 + $0x18] sm:$0xff]  ;;  %v49_v6 = vld [vmem:[%s559_s1 + $0x20] sm:$0xff] }
  0x15   :  { %v373_v5 = vpack.c.bf16 %v48_v4, %v47_v2  ;;  %v50_v7 = vld [vmem:[%s559_s1 + $0x28] sm:$0xff]  ;;  %v29_v8 = vld [vmem:[#allocation2] sm:$0xff]  ;;  %v51_v11 = vld [vmem:[%s559_s1 + $0x30] sm:$0xff] }
  0x16   :  { %370 = vmatprep.subr.bf16.mxu0 %v369_v3  ;;  %385 = vmatprep.subr.bf16.mxu1 %v369_v3  ;;  %v37_v9 = vld [vmem:[#allocation2 + $0x40] sm:$0xff]  ;;  %v377_v10 = vpack.c.bf16 %v50_v7, %v49_v6  ;;  %v52_v12 = vld [vmem:[%s559_s1 + $0x38] sm:$0xff]  ;;  %v30_v14 = vld [vmem:[#allocation2 + $0x8] sm:$0xff] }
  0x17   :  { %372 = vmatpush3.bf16.msra.mxu0 %v369_v3  ;;  %389 = vmatpush3.bf16.msra.mxu1 %v369_v3  ;;  %v381_v13 = vpack.c.bf16 %v52_v12, %v51_v11  ;;  %v38_v15 = vld [vmem:[#allocation2 + $0x48] sm:$0xff]  ;;  %v31_v16 = vld [vmem:[#allocation2 + $0x10] sm:$0xff]  ;;  %v32_v18 = vld [vmem:[#allocation2 + $0x18] sm:$0xff] }
  0x18   :  { %374 = vmatprep.subr.bf16.mxu0 %v373_v5  ;;  %386 = vmatprep.subr.bf16.mxu1 %v373_v5  ;;  %v39_v17 = vld [vmem:[#allocation2 + $0x50] sm:$0xff]  ;;  %v40_v19 = vld [vmem:[#allocation2 + $0x58] sm:$0xff]  ;;  %v33_v20 = vld [vmem:[#allocation2 + $0x20] sm:$0xff] }
  0x19   :  { %345 = vmatprep.mubr.msk.f32.mxu0 %vm60_vm0, %v29_v8  ;;  %357 = vmatprep.mubr.msk.f32.mxu1 %vm60_vm0, %v37_v9  ;;  %v41_v21 = vld [vmem:[#allocation2 + $0x60] sm:$0xff]  ;;  %v34_v22 = vld [vmem:[#allocation2 + $0x28] sm:$0xff]  ;;  %v35_v24 = vld [vmem:[#allocation2 + $0x30] sm:$0xff] }
  0x1a   :  { %v42_v23 = vld [vmem:[#allocation2 + $0x68] sm:$0xff]  ;;  %v43_v25 = vld [vmem:[#allocation2 + $0x70] sm:$0xff]  ;;  %v36_v26 = vld [vmem:[#allocation2 + $0x38] sm:$0xff] }
  0x1b   :  { %376 = vmatpush3.bf16.msra.mxu0 %v373_v5  ;;  %390 = vmatpush3.bf16.msra.mxu1 %v373_v5  ;;  %v44_v27 = vld [vmem:[#allocation2 + $0x78] sm:$0xff]  ;;  %v288_v28 = vld [vmem:[%s560_s2] ss:$0 sm:$0xff]  ;;  %s448_s2 = smov [#allocation5]  }
  0x1c   :  { %378 = vmatprep.subr.bf16.mxu0 %v377_v10  ;;  %387 = vmatprep.subr.bf16.mxu1 %v377_v10  ;;  %s276_s15 = sshll.u32 %s448_s2, 4  ;;  %s277_s15 = int_to_ptr.vmem [resolvable:$true] %s276_s15 }
  0x1d   :  { %s419_s16 = scalar_lea.vmem %s277_s15, 2048  ;;  %p424_p9 = scmp.lt.s32.totalorder %s277_s15, %s277_s15 }
  0x1e   :  { %p420_p8 = scmp.ne.s32.totalorder %s277_s15, %s419_s16  ;;  %p425_p10 = scmp.lt.s32.totalorder %s419_s16, %s419_s16 }
  0x1f   :  { %380 = vmatpush3.bf16.msra.mxu0 %v377_v10  ;;  %391 = vmatpush3.bf16.msra.mxu1 %v377_v10 }
  0x20   :  { %382 = vmatprep.subr.bf16.mxu0 %v381_v13  ;;  %388 = vmatprep.subr.bf16.mxu1 %v381_v13  ;;  %p426_p11 = por %p425_p10, %p424_p9 }
  0x22   :  { %p427_p12 = pnand %p426_p11, %p420_p8 }
  0x23   :  { %384 = vmatpush3.bf16.msra.mxu0 %v381_v13  ;;  %392 = vmatpush3.bf16.msra.mxu1 %v381_v13 }
  0x26   :  { %346 = vmatmul.mubr.msk.f32.vlgmr.msra.gmra.mrb[0].mxu0 %vm60_vm0, %v30_v14  ;;  %358 = vmatmul.mubr.msk.f32.vlgmr.msra.gmra.mrb[0].mxu1 %vm60_vm0, %v38_v15 }
  0x27   :  { %348 = vmatprep.mubr.msk.f32.mxu0 %vm60_vm0, %v31_v16  ;;  %360 = vmatprep.mubr.msk.f32.mxu1 %vm60_vm0, %v39_v17 }
  0x2a   :  { %349 = vmatmul.mubr.msk.f32.gmra.mrb[2].mxu0 %vm60_vm0, %v32_v18  ;;  %361 = vmatmul.mubr.msk.f32.gmra.mrb[2].mxu1 %vm60_vm0, %v40_v19 }
  0x2b   :  { %351 = vmatprep.mubr.msk.f32.mxu0 %vm60_vm0, %v33_v20  ;;  %363 = vmatprep.mubr.msk.f32.mxu1 %vm60_vm0, %v41_v21 }
  0x2e   :  { %352 = vmatmul.mubr.msk.f32.gmra.mrb[4].mxu0 %vm60_vm0, %v34_v22  ;;  %364 = vmatmul.mubr.msk.f32.gmra.mrb[4].mxu1 %vm60_vm0, %v42_v23 }
  0x2f   :  { %354 = vmatprep.mubr.msk.f32.mxu0 %vm60_vm0, %v35_v24  ;;  %366 = vmatprep.mubr.msk.f32.mxu1 %vm60_vm0, %v43_v25 }
  0x32   :  { %355 = vmatmul.mubr.msk.f32.gmra.mrb[6].mxu0 %vm60_vm0, %v36_v26  ;;  %367 = vmatmul.mubr.msk.f32.gmra.mrb[6].mxu1 %vm60_vm0, %v44_v27 }
  0xf9   :  { %v347_v29 = vpop.f32.mrb[0].mxu0  ;;  %v359_v30 = vpop.f32.mrb[0].mxu1 }
  0xfa   :  { %v181_v31 = vadd.f32 %v347_v29, %v288_v28  ;;  %v221_v32 = vadd.f32 %v359_v30, %v288_v28  ;;  %v175_v33 = vpop.f32.mrb[1].mxu0  ;;  %v215_v34 = vpop.f32.mrb[1].mxu1 }
  0xfb   :  { %v176_v35 = vadd.f32 %v288_v28, %v175_v33  ;;  %v216_v36 = vadd.f32 %v288_v28, %v215_v34 }
  0xfc   :  { %256 = vst.msk [vmem:[#allocation5 + $0x8] sm:$0xff] %vm254_vm1, %v181_v31  ;;  %264 = vst.msk [vmem:[#allocation5 + $0x48] sm:$0xff] %vm254_vm1, %v221_v32 }
  0xfd   :  { %255 = vst.msk [vmem:[#allocation5] sm:$0xff] %vm254_vm1, %v176_v35  ;;  %263 = vst.msk [vmem:[#allocation5 + $0x40] sm:$0xff] %vm254_vm1, %v216_v36  ;;  %v350_v37 = vpop.f32.mrb[2].mxu0  ;;  %v362_v38 = vpop.f32.mrb[2].mxu1 }
  0xfe   :  { %v191_v39 = vadd.f32 %v350_v37, %v288_v28  ;;  %v231_v40 = vadd.f32 %v362_v38, %v288_v28  ;;  %v185_v41 = vpop.f32.mrb[3].mxu0  ;;  %v225_v42 = vpop.f32.mrb[3].mxu1 }
  0xff   :  { %v186_v43 = vadd.f32 %v288_v28, %v185_v41  ;;  %v226_v44 = vadd.f32 %v288_v28, %v225_v42 }
 0x100   :  { %258 = vst.msk [vmem:[#allocation5 + $0x18] sm:$0xff] %vm254_vm1, %v191_v39  ;;  %266 = vst.msk [vmem:[#allocation5 + $0x58] sm:$0xff] %vm254_vm1, %v231_v40 }
 0x101   :  { %257 = vst.msk [vmem:[#allocation5 + $0x10] sm:$0xff] %vm254_vm1, %v186_v43  ;;  %265 = vst.msk [vmem:[#allocation5 + $0x50] sm:$0xff] %vm254_vm1, %v226_v44  ;;  %v353_v45 = vpop.f32.mrb[4].mxu0  ;;  %v365_v46 = vpop.f32.mrb[4].mxu1 }
 0x102   :  { %v201_v47 = vadd.f32 %v353_v45, %v288_v28  ;;  %v241_v48 = vadd.f32 %v365_v46, %v288_v28  ;;  %v195_v49 = vpop.f32.mrb[5].mxu0  ;;  %v235_v50 = vpop.f32.mrb[5].mxu1 }
 0x103   :  { %v196_v51 = vadd.f32 %v288_v28, %v195_v49  ;;  %v236_v52 = vadd.f32 %v288_v28, %v235_v50 }
 0x104   :  { %260 = vst.msk [vmem:[#allocation5 + $0x28] sm:$0xff] %vm254_vm1, %v201_v47  ;;  %268 = vst.msk [vmem:[#allocation5 + $0x68] sm:$0xff] %vm254_vm1, %v241_v48 }
 0x105   :  { %259 = vst.msk [vmem:[#allocation5 + $0x20] sm:$0xff] %vm254_vm1, %v196_v51  ;;  %267 = vst.msk [vmem:[#allocation5 + $0x60] sm:$0xff] %vm254_vm1, %v236_v52  ;;  %v356_v53 = vpop.f32.mrb[6].mxu0  ;;  %v368_v54 = vpop.f32.mrb[6].mxu1 }
 0x106   :  { %v211_v55 = vadd.f32 %v356_v53, %v288_v28  ;;  %v251_v56 = vadd.f32 %v368_v54, %v288_v28  ;;  %v205_v57 = vpop.f32.mrb[7].mxu0  ;;  %v245_v58 = vpop.f32.mrb[7].mxu1 }
 0x107   :  { %v206_v59 = vadd.f32 %v288_v28, %v205_v57  ;;  %v246_v60 = vadd.f32 %v288_v28, %v245_v58 }
 0x108   :  { %262 = vst.msk [vmem:[#allocation5 + $0x38] sm:$0xff] %vm254_vm1, %v211_v55  ;;  %270 = vst.msk [vmem:[#allocation5 + $0x78] sm:$0xff] %vm254_vm1, %v251_v56 }
 0x109   :  { %261 = vst.msk [vmem:[#allocation5 + $0x30] sm:$0xff] %vm254_vm1, %v206_v59  ;;  %269 = vst.msk [vmem:[#allocation5 + $0x70] sm:$0xff] %vm254_vm1, %v246_v60 }
 0x10a   :  { %430 = shalt.err (!%p427_p12)
}
 0x10b   :  { %s431_s19 = scalar_lea.hbm %s561_s3, 2048 }
 0x10c   :  { %p432_p13 = scmp.ne.s32.totalorder %s561_s3, %s431_s19  ;;  %p435_p0 = scmp.lt.u32.totalorder %s431_s19, %s561_s3 }
 0x10e   :  { %p437_p1 = pnand %p435_p0, %p432_p13 }
 0x110   :  { %440 = shalt.err (!%p437_p1)
}
 0x111   :  { %282 = dma.vmem_to_hbm [thread:$0]  %s277_s15, 2048, %s561_s3, [#allocation4], %s446_s22, %s446_s22, %s447_s23  }
 0x112   :  { %443 = dma.done.wait [#allocation4], 2048  }
 0x113   :  { %444 = vsyncadd [#allocation4], 4294965248 }
 0x114   :  { %286 = vsyncpa [#allocation3], 1 }
 0x115   :  { %287 = vsyncpa [#allocation4], 1 }

</bundles_post_ra>
